<compile_context>
chip_gen: v7x
topology: tpu7x:2x2x1
jax: 0.10.0
libtpu: 0.0.40
codegen_flags: <defaults>
</compile_context>

<pallas_src>
import math

import jax
import jax.numpy as jnp
from jax.experimental import pallas as pl
from jax.experimental.pallas import tpu as pltpu


def _round_up(x, m):
    return (x + m - 1) // m * m


def _make_fused_head_kernel(num_hidden, kernel_size):
    pad = kernel_size // 2

    def _stack_taps(h):
        # h: (T, C) f32. Returns (T, K*C) where column block k holds h[t + k - pad, :]
        # (zeros outside [0, T)), so ONE dot against the (K*C, Cout) reshaped conv weight
        # computes the full 'same'-padded conv (contraction depth K*C instead of C).
        T, C = h.shape
        taps = []
        for k in range(kernel_size):
            s = k - pad  # tap k reads h[t + s]
            if s == 0:
                taps.append(h)
            elif s > 0:
                taps.append(jnp.concatenate(
                    [h[s:, :], jnp.zeros((s, C), h.dtype)], axis=0))
            else:
                taps.append(jnp.concatenate(
                    [jnp.zeros((-s, C), h.dtype), h[:T + s, :]], axis=0))
        return jnp.concatenate(taps, axis=-1)

    def kernel(len_ref, x_ref, *rest):
        # len_ref : SMEM (B,) int32 valid lengths (scalar prefetch)
        # x_ref   : (T, Cin) bf16 input slab for one batch element
        # rest    : (w_0, b_0, ..., w_{H-1}, b_{H-1}, w_cls, b_cls, o_ref)
        #           w_i: (K*Cin_i, Cout_i) bf16, b_i: (1, Cout_i) f32
        # o_ref   : (T, Cout_padded) f32
        o_ref = rest[-1]
        params = rest[:-1]
        length = len_ref[pl.program_id(0)]

        T = x_ref.shape[0]
        # Prefix-valid mask, built once in-register and broadcast into every layer.
        t_idx = jax.lax.broadcasted_iota(jnp.int32, (T, 1), 0)
        valid = t_idx < length                                      # (T, 1) bool

        h = x_ref[...].astype(jnp.float32)
        for layer in range(num_hidden + 1):
            w_ref = params[2 * layer]
            b_ref = params[2 * layer + 1]
            hs = _stack_taps(h).astype(jnp.bfloat16)                # (T, K*C) bf16 for MXU
            acc = jnp.dot(hs, w_ref[...], preferred_element_type=jnp.float32)
            acc = acc + b_ref[...]                                  # (1, Cout) broadcast, f32
            # MaskedConv1D: conv output * mask (prefix mask rebuilt from the length).
            acc = jnp.where(valid, acc, 0.0)
            if layer < num_hidden:
                h = jnp.maximum(acc, 0.0)   # norm = Identity (with_ln=False), act = ReLU
            else:
                o_ref[...] = acc.astype(o_ref.dtype)

    return kernel


def fused_cls_head_level(x, lengths, weights_bf16, biases_f32, *, num_classes, kernel_size,
                         vmem_limit_bytes=32 * 1024 * 1024):
    """Fused head for one FPN level.

    x:            (B, T, Cin) float32 (cast to bf16 before the kernel to halve input DMA)
    lengths:      (B,) int32 valid prefix lengths
    weights_bf16: list of (K*Cin_i, Cout_i) bf16 (hidden layers..., cls layer lane-padded)
    biases_f32:   list of (1, Cout_i) float32
    returns       (B, T, num_classes) float32 logits
    """
    B, T, Cin = x.shape
    num_hidden = len(weights_bf16) - 1
    c_padded = weights_bf16[-1].shape[1]

    kern = _make_fused_head_kernel(num_hidden=num_hidden, kernel_size=kernel_size)

    x_bf16 = x.astype(jnp.bfloat16)   # same rounding the kernel applied pre-matmul anyway

    in_specs = [pl.BlockSpec((None, T, Cin), lambda b, lens: (b, 0, 0))]
    operands = [x_bf16]
    for w, bias in zip(weights_bf16, biases_f32):
        in_specs.append(pl.BlockSpec(w.shape, lambda b, lens: (0, 0)))
        in_specs.append(pl.BlockSpec(bias.shape, lambda b, lens: (0, 0)))
        operands.append(w)
        operands.append(bias)

    out_padded = pl.pallas_call(
        kern,
        out_shape=jax.ShapeDtypeStruct((B, T, c_padded), jnp.float32),
        grid_spec=pltpu.PrefetchScalarGridSpec(
            num_scalar_prefetch=1,
            grid=(B,),
            in_specs=in_specs,
            out_specs=pl.BlockSpec((None, T, c_padded), lambda b, lens: (b, 0, 0)),
        ),
        compiler_params=pltpu.CompilerParams(
            dimension_semantics=("parallel",),          # v7x megacore splits over batch
            vmem_limit_bytes=vmem_limit_bytes,
        ),
    )(lengths, *operands)
    return out_padded[..., :num_classes]


class PtTransformerClsHeadPallas:
    """JAX/Pallas port of PtTransformerClsHead (with_ln=False, detach_feat=False)."""

    def __init__(self, input_dim, feat_dim, num_classes, prior_prob=0.01,
                 num_layers=3, kernel_size=3, empty_cls=(), key=None):
        assert kernel_size % 2 == 1, "'same' padding matches torch Conv1d only for odd kernel_size"
        if key is None:
            key = jax.random.PRNGKey(0)
        keys = jax.random.split(key, num_layers)

        self.num_classes = num_classes
        self.kernel_size = kernel_size

        # f32 master params (also used by the pure-JAX reference); kernel operands derived below.
        self.params_f32 = []   # [(w (K, Cin, Cout), b (Cout,)), ...] hidden layers
        for i in range(num_layers - 1):
            cin = input_dim if i == 0 else feat_dim
            bound = 1.0 / math.sqrt(cin * kernel_size)      # torch Conv1d default init range
            w = jax.random.uniform(keys[i], (kernel_size, cin, feat_dim),
                                   jnp.float32, -bound, bound)
            b = jnp.zeros((feat_dim,), jnp.float32)         # MaskedConv1D zero-inits bias
            self.params_f32.append((w, b))

        bound = 1.0 / math.sqrt(feat_dim * kernel_size)
        w_cls = jax.random.uniform(keys[-1], (kernel_size, feat_dim, num_classes),
                                   jnp.float32, -bound, bound)
        bias_value = -math.log((1.0 - prior_prob) / prior_prob)
        b_cls = jnp.full((num_classes,), bias_value, jnp.float32)
        if len(empty_cls) > 0:
            empty_value = -math.log((1.0 - 1e-6) / 1e-6)
            b_cls = b_cls.at[jnp.asarray(list(empty_cls), jnp.int32)].set(empty_value)
        self.cls_params_f32 = (w_cls, b_cls)

        # Kernel-side params: conv taps folded into the contraction dim, bf16 weights, and the
        # cls output channel zero-padded to a lane-dense multiple of 128.
        self.weights_bf16 = []
        self.biases_f32 = []
        for (w, b) in self.params_f32:
            k, cin, cout = w.shape
            self.weights_bf16.append(w.reshape(k * cin, cout).astype(jnp.bfloat16))
            self.biases_f32.append(b.reshape(1, cout))
        c_padded = _round_up(num_classes, 128)
        w_cls_p = jnp.pad(w_cls, ((0, 0), (0, 0), (0, c_padded - num_classes)))
        b_cls_p = jnp.pad(b_cls, (0, c_padded - num_classes))
        self.weights_bf16.append(
            w_cls_p.reshape(kernel_size * feat_dim, c_padded).astype(jnp.bfloat16))
        self.biases_f32.append(b_cls_p.reshape(1, c_padded))
        # TODO(synk): with_ln=True LayerNorm branch not implemented (module default is Identity);
        # detach_feat is an autograd concept and a no-op in this inference-only forward.

    def __call__(self, fpn_feats, fpn_masks):
        assert len(fpn_feats) == len(fpn_masks)
        out_logits = ()
        for cur_feat, cur_mask in zip(fpn_feats, fpn_masks):
            B = cur_feat.shape[0]
            # actionformer FPN masks are prefix-valid (arange(T) < len); collapse them to lengths
            # so the kernel rebuilds the mask in-register instead of DMA-ing a lane-sparse (T, 1)
            # stream once per layer.
            lengths = jnp.sum((cur_mask.reshape(B, -1) != 0).astype(jnp.int32), axis=-1)
            cur_logits = fused_cls_head_level(
                cur_feat, lengths.astype(jnp.int32), self.weights_bf16, self.biases_f32,
                num_classes=self.num_classes, kernel_size=self.kernel_size)
            out_logits += (cur_logits,)
        return out_logits


# ----------------------------- pure-JAX references (for testing) -----------------------------

def _ref_masked_conv1d(x, mask, w, b, relu, bf16_matmul):
    K, cin, cout = w.shape
    pad = K // 2
    T = x.shape[1]
    xp = jnp.pad(x, ((0, 0), (pad, pad), (0, 0)))
    xs = jnp.concatenate([xp[:, k:k + T, :] for k in range(K)], axis=-1)   # (B, T, K*cin)
    wf = w.reshape(K * cin, cout)
    if bf16_matmul:
        xs = xs.astype(jnp.bfloat16)
        wf = wf.astype(jnp.bfloat16)
    out = jnp.einsum("btc,co->bto", xs, wf,
                     preferred_element_type=jnp.float32) + b[None, None, :]
    out = out * mask
    if relu:
        out = jnp.maximum(out, 0.0)
    return out


def _ref_forward(head, fpn_feats, fpn_masks, bf16_matmul):
    outs = ()
    for feat, mask in zip(fpn_feats, fpn_masks):
        cur = feat.astype(jnp.bfloat16).astype(jnp.float32) if bf16_matmul else feat
        m = mask.astype(jnp.float32)
        for (w, b) in head.params_f32:
            cur = _ref_masked_conv1d(cur, m, w, b, relu=True, bf16_matmul=bf16_matmul)
        w_cls, b_cls = head.cls_params_f32
        outs += (_ref_masked_conv1d(cur, m, w_cls, b_cls, relu=False, bf16_matmul=bf16_matmul),)
    return outs


if __name__ == "__main__":
    key = jax.random.PRNGKey(0)
    k_param, k_x0, k_x1 = jax.random.split(key, 3)

    B = 2
    input_dim = 32
    feat_dim = 32
    num_classes = 8

    head = PtTransformerClsHeadPallas(input_dim, feat_dim, num_classes,
                                      prior_prob=0.01, num_layers=3,
                                      kernel_size=3, key=k_param)

    # two FPN levels with T = 16 and T = 8 (layout (B, T, C))
    feat0 = jax.random.normal(k_x0, (B, 16, input_dim), jnp.float32)
    feat1 = jax.random.normal(k_x1, (B, 8, input_dim), jnp.float32)

    # masks: valid prefix lengths per batch element, shape (B, T, 1)
    def make_mask(T, lengths):
        t = jnp.arange(T)[None, :, None]
        return (t < jnp.asarray(lengths)[:, None, None]).astype(jnp.float32)

    mask0 = make_mask(16, [16, 10])
    mask1 = make_mask(8, [8, 5])

    fpn_feats = (feat0, feat1)
    fpn_masks = (mask0, mask1)

    out = head(fpn_feats, fpn_masks)
    out = jax.block_until_ready(out)

    # Tight check vs a reference that mirrors the kernel numerics (bf16 matmuls, f32 accumulate).
    ref_bf16 = _ref_forward(head, fpn_feats, fpn_masks, bf16_matmul=True)
    # Loose check vs the pure-f32 PyTorch-equivalent math (difference = bf16 MXU rounding only).
    ref_f32 = _ref_forward(head, fpn_feats, fpn_masks, bf16_matmul=False)

    for o, rb, rf in zip(out, ref_bf16, ref_f32):
        assert o.shape == rf.shape
        assert jnp.allclose(o, rb, atol=1e-3, rtol=1e-3), "mismatch vs bf16-matched reference"
        assert jnp.allclose(o, rf, atol=3e-2, rtol=3e-2), "mismatch vs f32 reference"

    print("KERNEL_OK")
</pallas_src>

<mosaic_0001>
module attributes {stable_mosaic.version = 11 : i64} {
  func.func @kernel(%arg0: i32, %arg1: memref<2xi32, #tpu.memory_space<smem>>, %arg2: memref<1x16x32xbf16, #tpu.memory_space<vmem>>, %arg3: memref<96x32xbf16, #tpu.memory_space<vmem>>, %arg4: memref<1x32xf32, #tpu.memory_space<vmem>>, %arg5: memref<96x32xbf16, #tpu.memory_space<vmem>>, %arg6: memref<1x32xf32, #tpu.memory_space<vmem>>, %arg7: memref<96x128xbf16, #tpu.memory_space<vmem>>, %arg8: memref<1x128xf32, #tpu.memory_space<vmem>>, %arg9: memref<1x16x128xf32, #tpu.memory_space<vmem>>) attributes {dimension_semantics = [#tpu.dimension_semantics<parallel>], iteration_bounds = array<i64: 2>, scalar_prefetch = 1 : i64, scratch_operands = 0 : i64, tpu.core_type = #tpu.core_type<tc>, window_params = [{transform_indices = @transform_0, window_bounds = array<i64: 1, 16, 32>}, {pipeline_mode = #tpu.pipeline_mode<synchronous>, transform_indices = @transform_1, window_bounds = array<i64: 96, 32>}, {pipeline_mode = #tpu.pipeline_mode<synchronous>, transform_indices = @transform_2, window_bounds = array<i64: 1, 32>}, {pipeline_mode = #tpu.pipeline_mode<synchronous>, transform_indices = @transform_3, window_bounds = array<i64: 96, 32>}, {pipeline_mode = #tpu.pipeline_mode<synchronous>, transform_indices = @transform_4, window_bounds = array<i64: 1, 32>}, {pipeline_mode = #tpu.pipeline_mode<synchronous>, transform_indices = @transform_5, window_bounds = array<i64: 96, 128>}, {pipeline_mode = #tpu.pipeline_mode<synchronous>, transform_indices = @transform_6, window_bounds = array<i64: 1, 128>}, {transform_indices = @transform_7, window_bounds = array<i64: 1, 16, 128>}]} {
    %0 = arith.index_cast %arg0 : i32 to index
    %1 = memref.load %arg1[%0] : memref<2xi32, #tpu.memory_space<smem>>
    %2 = tpu.iota {dimensions = array<i32: 0>} : vector<16x1xi32>
    %3 = vector.broadcast %1 : i32 to vector<16x1xi32>
    %4 = arith.cmpi slt, %2, %3 : vector<16x1xi32>
    %c0 = arith.constant 0 : index
    %c0_0 = arith.constant 0 : index
    %c0_1 = arith.constant 0 : index
    %5 = vector.load %arg2[%c0, %c0_0, %c0_1] : memref<1x16x32xbf16, #tpu.memory_space<vmem>>, vector<1x16x32xbf16>
    %6 = vector.shape_cast %5 : vector<1x16x32xbf16> to vector<16x32xbf16>
    %7 = arith.extf %6 : vector<16x32xbf16> to vector<16x32xf32>
    %cst = arith.constant 0.000000e+00 : f32
    %8 = vector.broadcast %cst : f32 to vector<1x32xf32>
    %9 = vector.extract_strided_slice %7 {offsets = [0, 0], sizes = [15, 32], strides = [1, 1]} : vector<16x32xf32> to vector<15x32xf32>
    %10 = tpu.concatenate %8, %9 in 0 : vector<1x32xf32>, vector<15x32xf32> -> vector<16x32xf32>
    %11 = vector.extract_strided_slice %7 {offsets = [1, 0], sizes = [15, 32], strides = [1, 1]} : vector<16x32xf32> to vector<15x32xf32>
    %cst_2 = arith.constant 0.000000e+00 : f32
    %12 = vector.broadcast %cst_2 : f32 to vector<1x32xf32>
    %13 = tpu.concatenate %11, %12 in 0 : vector<15x32xf32>, vector<1x32xf32> -> vector<16x32xf32>
    %14 = tpu.concatenate %10, %7, %13 in 1 : vector<16x32xf32>, vector<16x32xf32>, vector<16x32xf32> -> vector<16x96xf32>
    %15 = arith.truncf %14 : vector<16x96xf32> to vector<16x96xbf16>
    %c0_3 = arith.constant 0 : index
    %c0_4 = arith.constant 0 : index
    %16 = vector.load %arg3[%c0_3, %c0_4] : memref<96x32xbf16, #tpu.memory_space<vmem>>, vector<96x32xbf16>
    %cst_5 = arith.constant dense<0.000000e+00> : vector<16x32xf32>
    %17 = tpu.matmul %15, %16, %cst_5 {dimension_numbers = #tpu.dot_dimension_numbers<[1], [0], [0], [1], [0, 0, 1, 1], [], []>} : vector<16x96xbf16>, vector<96x32xbf16>, vector<16x32xf32> -> vector<16x32xf32>
    %c0_6 = arith.constant 0 : index
    %c0_7 = arith.constant 0 : index
    %18 = vector.load %arg4[%c0_6, %c0_7] : memref<1x32xf32, #tpu.memory_space<vmem>>, vector<1x32xf32>
    %19 = vector.broadcast %18 : vector<1x32xf32> to vector<16x32xf32>
    %20 = arith.addf %17, %19 : vector<16x32xf32>
    %cst_8 = arith.constant 0.000000e+00 : f32
    %21 = vector.shape_cast %4 : vector<16x1xi1> to vector<16x1xi1>
    %22 = vector.broadcast %21 : vector<16x1xi1> to vector<16x32xi1>
    %23 = vector.broadcast %cst_8 : f32 to vector<16x32xf32>
    %24 = arith.select %22, %20, %23 : vector<16x32xi1>, vector<16x32xf32>
    %cst_9 = arith.constant 0.000000e+00 : f32
    %25 = vector.broadcast %cst_9 : f32 to vector<16x32xf32>
    %26 = arith.maximumf %24, %25 : vector<16x32xf32>
    %cst_10 = arith.constant 0.000000e+00 : f32
    %27 = vector.broadcast %cst_10 : f32 to vector<1x32xf32>
    %28 = vector.extract_strided_slice %26 {offsets = [0, 0], sizes = [15, 32], strides = [1, 1]} : vector<16x32xf32> to vector<15x32xf32>
    %29 = tpu.concatenate %27, %28 in 0 : vector<1x32xf32>, vector<15x32xf32> -> vector<16x32xf32>
    %30 = vector.extract_strided_slice %26 {offsets = [1, 0], sizes = [15, 32], strides = [1, 1]} : vector<16x32xf32> to vector<15x32xf32>
    %cst_11 = arith.constant 0.000000e+00 : f32
    %31 = vector.broadcast %cst_11 : f32 to vector<1x32xf32>
    %32 = tpu.concatenate %30, %31 in 0 : vector<15x32xf32>, vector<1x32xf32> -> vector<16x32xf32>
    %33 = tpu.concatenate %29, %26, %32 in 1 : vector<16x32xf32>, vector<16x32xf32>, vector<16x32xf32> -> vector<16x96xf32>
    %34 = arith.truncf %33 : vector<16x96xf32> to vector<16x96xbf16>
    %c0_12 = arith.constant 0 : index
    %c0_13 = arith.constant 0 : index
    %35 = vector.load %arg5[%c0_12, %c0_13] : memref<96x32xbf16, #tpu.memory_space<vmem>>, vector<96x32xbf16>
    %cst_14 = arith.constant dense<0.000000e+00> : vector<16x32xf32>
    %36 = tpu.matmul %34, %35, %cst_14 {dimension_numbers = #tpu.dot_dimension_numbers<[1], [0], [0], [1], [0, 0, 1, 1], [], []>} : vector<16x96xbf16>, vector<96x32xbf16>, vector<16x32xf32> -> vector<16x32xf32>
    %c0_15 = arith.constant 0 : index
    %c0_16 = arith.constant 0 : index
    %37 = vector.load %arg6[%c0_15, %c0_16] : memref<1x32xf32, #tpu.memory_space<vmem>>, vector<1x32xf32>
    %38 = vector.broadcast %37 : vector<1x32xf32> to vector<16x32xf32>
    %39 = arith.addf %36, %38 : vector<16x32xf32>
    %cst_17 = arith.constant 0.000000e+00 : f32
    %40 = vector.shape_cast %4 : vector<16x1xi1> to vector<16x1xi1>
    %41 = vector.broadcast %40 : vector<16x1xi1> to vector<16x32xi1>
    %42 = vector.broadcast %cst_17 : f32 to vector<16x32xf32>
    %43 = arith.select %41, %39, %42 : vector<16x32xi1>, vector<16x32xf32>
    %cst_18 = arith.constant 0.000000e+00 : f32
    %44 = vector.broadcast %cst_18 : f32 to vector<16x32xf32>
    %45 = arith.maximumf %43, %44 : vector<16x32xf32>
    %cst_19 = arith.constant 0.000000e+00 : f32
    %46 = vector.broadcast %cst_19 : f32 to vector<1x32xf32>
    %47 = vector.extract_strided_slice %45 {offsets = [0, 0], sizes = [15, 32], strides = [1, 1]} : vector<16x32xf32> to vector<15x32xf32>
    %48 = tpu.concatenate %46, %47 in 0 : vector<1x32xf32>, vector<15x32xf32> -> vector<16x32xf32>
    %49 = vector.extract_strided_slice %45 {offsets = [1, 0], sizes = [15, 32], strides = [1, 1]} : vector<16x32xf32> to vector<15x32xf32>
    %cst_20 = arith.constant 0.000000e+00 : f32
    %50 = vector.broadcast %cst_20 : f32 to vector<1x32xf32>
    %51 = tpu.concatenate %49, %50 in 0 : vector<15x32xf32>, vector<1x32xf32> -> vector<16x32xf32>
    %52 = tpu.concatenate %48, %45, %51 in 1 : vector<16x32xf32>, vector<16x32xf32>, vector<16x32xf32> -> vector<16x96xf32>
    %53 = arith.truncf %52 : vector<16x96xf32> to vector<16x96xbf16>
    %c0_21 = arith.constant 0 : index
    %c0_22 = arith.constant 0 : index
    %54 = vector.load %arg7[%c0_21, %c0_22] : memref<96x128xbf16, #tpu.memory_space<vmem>>, vector<96x128xbf16>
    %cst_23 = arith.constant dense<0.000000e+00> : vector<16x128xf32>
    %55 = tpu.matmul %53, %54, %cst_23 {dimension_numbers = #tpu.dot_dimension_numbers<[1], [0], [0], [1], [0, 0, 1, 1], [], []>} : vector<16x96xbf16>, vector<96x128xbf16>, vector<16x128xf32> -> vector<16x128xf32>
    %c0_24 = arith.constant 0 : index
    %c0_25 = arith.constant 0 : index
    %56 = vector.load %arg8[%c0_24, %c0_25] : memref<1x128xf32, #tpu.memory_space<vmem>>, vector<1x128xf32>
    %57 = vector.broadcast %56 : vector<1x128xf32> to vector<16x128xf32>
    %58 = arith.addf %55, %57 : vector<16x128xf32>
    %cst_26 = arith.constant 0.000000e+00 : f32
    %59 = vector.shape_cast %4 : vector<16x1xi1> to vector<16x1xi1>
    %60 = vector.broadcast %59 : vector<16x1xi1> to vector<16x128xi1>
    %61 = vector.broadcast %cst_26 : f32 to vector<16x128xf32>
    %62 = arith.select %60, %58, %61 : vector<16x128xi1>, vector<16x128xf32>
    %c0_27 = arith.constant 0 : index
    %c0_28 = arith.constant 0 : index
    %c0_29 = arith.constant 0 : index
    %63 = vector.load %arg9[%c0_27, %c0_28, %c0_29] : memref<1x16x128xf32, #tpu.memory_space<vmem>>, vector<1x16x128xf32>
    %64 = vector.shape_cast %63 : vector<1x16x128xf32> to vector<16x128xf32>
    %65 = vector.shape_cast %62 : vector<16x128xf32> to vector<1x16x128xf32>
    tpu.vector_store %arg9[%c0_27, %c0_28, %c0_29], %65 {strides = array<i32>} : memref<1x16x128xf32, #tpu.memory_space<vmem>>, vector<1x16x128xf32>,
    return
  }
  func.func @transform_0(%arg0: i32, %arg1: memref<2xi32, #tpu.memory_space<smem>>) -> (i32, i32, i32) {
    %c0_i32 = arith.constant 0 : i32
    %c0_i32_0 = arith.constant 0 : i32
    %c0_i32_1 = arith.constant 0 : i32
    return %arg0, %c0_i32, %c0_i32_0 : i32, i32, i32
  }
  func.func @transform_1(%arg0: i32, %arg1: memref<2xi32, #tpu.memory_space<smem>>) -> (i32, i32) {
    %c0_i32 = arith.constant 0 : i32
    %c0_i32_0 = arith.constant 0 : i32
    %c0_i32_1 = arith.constant 0 : i32
    return %c0_i32, %c0_i32_0 : i32, i32
  }
  func.func @transform_2(%arg0: i32, %arg1: memref<2xi32, #tpu.memory_space<smem>>) -> (i32, i32) {
    %c0_i32 = arith.constant 0 : i32
    %c0_i32_0 = arith.constant 0 : i32
    %c0_i32_1 = arith.constant 0 : i32
    return %c0_i32, %c0_i32_0 : i32, i32
  }
  func.func @transform_3(%arg0: i32, %arg1: memref<2xi32, #tpu.memory_space<smem>>) -> (i32, i32) {
    %c0_i32 = arith.constant 0 : i32
    %c0_i32_0 = arith.constant 0 : i32
    %c0_i32_1 = arith.constant 0 : i32
    return %c0_i32, %c0_i32_0 : i32, i32
  }
  func.func @transform_4(%arg0: i32, %arg1: memref<2xi32, #tpu.memory_space<smem>>) -> (i32, i32) {
    %c0_i32 = arith.constant 0 : i32
    %c0_i32_0 = arith.constant 0 : i32
    %c0_i32_1 = arith.constant 0 : i32
    return %c0_i32, %c0_i32_0 : i32, i32
  }
  func.func @transform_5(%arg0: i32, %arg1: memref<2xi32, #tpu.memory_space<smem>>) -> (i32, i32) {
    %c0_i32 = arith.constant 0 : i32
    %c0_i32_0 = arith.constant 0 : i32
    %c0_i32_1 = arith.constant 0 : i32
    return %c0_i32, %c0_i32_0 : i32, i32
  }
  func.func @transform_6(%arg0: i32, %arg1: memref<2xi32, #tpu.memory_space<smem>>) -> (i32, i32) {
    %c0_i32 = arith.constant 0 : i32
    %c0_i32_0 = arith.constant 0 : i32
    %c0_i32_1 = arith.constant 0 : i32
    return %c0_i32, %c0_i32_0 : i32, i32
  }
  func.func @transform_7(%arg0: i32, %arg1: memref<2xi32, #tpu.memory_space<smem>>) -> (i32, i32, i32) {
    %c0_i32 = arith.constant 0 : i32
    %c0_i32_0 = arith.constant 0 : i32
    %c0_i32_1 = arith.constant 0 : i32
    return %arg0, %c0_i32, %c0_i32_0 : i32, i32, i32
  }
}

</mosaic_0001>

<bundles_post_ra>
// kernel: tpu_custom_call.1
= control target key start
LH: loop header
LB: loop body
LE: loop exit
PB: predicated region body
PF: predicated region fallthrough
CT: control target
= control target key end

     0   :  { %s1366_s0 = inlined_call_operand.vmem [shape: s32[2], index: 0, kind: input, shape index: {}]   ;;  %s1367_s1 = inlined_call_operand.vmem [shape: bf16[2,16,32], index: 1, kind: input, shape index: {}]   ;;  %s1368_s2 = inlined_call_operand.vmem [shape: bf16[96,32], index: 2, kind: input, shape index: {}]   ;;  %s1369_s3 = inlined_call_operand.vmem [shape: f32[1,32], index: 3, kind: input, shape index: {}]   ;;  %s1370_s4 = inlined_call_operand.vmem [shape: bf16[96,32], index: 4, kind: input, shape index: {}]   ;;  %s1371_s5 = inlined_call_operand.vmem [shape: f32[1,32], index: 5, kind: input, shape index: {}]   ;;  %s1372_s6 = inlined_call_operand.vmem [shape: bf16[96,128], index: 6, kind: input, shape index: {}]   ;;  %s1373_s7 = inlined_call_operand.vmem [shape: f32[1,128], index: 7, kind: input, shape index: {}]   ;;  %s1374_s8 = inlined_call_operand.hbm [shape: f32[2,16,128], index: 8, kind: output, shape index: {}]  }
   0x1   :  { %s13_s29 = sshll.u32 %s1366_s0, 4  ;;  %s14_s29 = int_to_ptr.vmem [resolvable:$true] %s13_s29 }
   0x2   :  { %s988_s30 = scalar_lea.vmem %s14_s29, 16  ;;  %p993_p1 = scmp.lt.s32.totalorder %s14_s29, %s14_s29 }
   0x3   :  { %p989_p0 = scmp.ne.s32.totalorder %s14_s29, %s988_s30  ;;  %p994_p2 = scmp.lt.s32.totalorder %s988_s30, %s988_s30 }
   0x5   :  { %p995_p3 = por %p994_p2, %p993_p1 }
   0x7   :  { %p996_p4 = pnand %p995_p3, %p989_p0 }
   0x9   :  { %999 = shalt.err (!%p996_p4)  }
   0xa   :  { %s1066_s9 = smov [#allocation3]  }
   0xb   :  { %16 = dma.vmem_to_smem %s14_s29, 16, %s1066_s9, [#allocation2] }
   0xc   :  { %1044 = dma.done.wait [#allocation2], 16 }
   0xd   :  { %1045 = vsyncadd [#allocation2], 4294967280 }
   0xe   :  { %18 = sfence }
   0xf   :  { %19 = vsyncpa [#allocation5], 0 }
  0x10   :  { %21 = vsyncpa [#allocation5 + $0x1], 0  ;;  %s1122_s10 = smov 0   ;;  %s1124_s11 = smov 0  }
  0x11   :  { %s1126_s0 = smov 0   ;;  %s1128_s12 = smov 0  }
  0x12 LB: > { %s1143_s13 = sadd.s32 4294967295, %s1064_s12   ;;  %s783_s14 = sadd.s32 4294967294, %s1064_s12   ;;  %s1064_s12 = sphi %s1128_s12, %s1384_s12   ;;  %s1060_s0 = sphi %s1126_s0, %s1383_s0   ;;  %s1056_s11 = sphi %s1124_s11, %s1382_s11   ;;  %s1052_s10 = sphi %s1122_s10, %s1381_s10  }
  0x13   : > { %s1147_s15 = sadd.s32 1, %s1064_s12   ;;  %s186_s16 = sadd.s32 1, %s1060_s0 }
  0x14   : > { %s183_s17 = ssub.s32 %s1064_s12, %s1147_s15  ;;  %p196_p5 = scmp.ne.s32.totalorder %s1060_s0, %s1056_s11 }
  0x15   : > { %p184_p6 = scmp.eq.s32.totalorder %s183_s17, 0  ;;  %p197_p7 = scmp.eq.s32.totalorder %s1143_s13, 1 }
  0x16   : > { %p202_p8 = scmp.ne.s32.totalorder %s1056_s11, %s1052_s10  ;;  %p203_p9 = scmp.eq.s32.totalorder %s783_s14, 1 }
  0x17   : > { %s1158_s18 = scalar_select %p184_p6, %s1060_s0, %s186_s16  }
  0x18   : > { %p1160_p10 = por %p197_p7, %p196_p5  ;;  %p1164_p11 = por %p203_p9, %p202_p8 }
  0x19   : > { %p786_p12 = scmp.ge.s32.totalorder %s1064_s12, 1  ;;  %p247_p13 = scmp.lt.s32.totalorder %s1064_s12, 3 }
  0x1b   : > { %p248_p0 = pnand %p786_p12, %p247_p13 }
  0x1c   : > { %p279_p1 = scmp.lt.s32.totalorder (!%p248_p0), %s1143_s13, 1  ;;  %v1067_v0 = vmov (!%p248_p0), 0.0   ;;  %v970_v1 = vld [vmem:[%s1368_s2] sm:$0xff] (!%p248_p0)   ;;  %v971_v2 = vld [vmem:[%s1368_s2 + $0x8] sm:$0xff] (!%p248_p0)   ;;  %vm305_vm0 = vcmask (!%p248_p0), 1046528   ;;  %v972_v6 = vld [vmem:[%s1368_s2 + $0x10] sm:$0xff] (!%p248_p0)   ;;  %v286_v35 = vlaneseq (!%p248_p0) }
  0x1d   : > { %251 = sbr.rel (%p248_p0) target bundleno = 1090 (0x442), region = 48  ;;  %846 = vmatprep.subr.bf16.mxu0 (!%p248_p0), %v1067_v0  ;;  %862 = vmatprep.subr.bf16.mxu1 (!%p248_p0), %v1067_v0  ;;  %vm298_vm1 = vcmask (!%p248_p0), 1040384   ;;  %vm1068_vm2 = vmmov (!%p248_p0), 0   ;;  %s1069_s14 = smov (!%p248_p0), 32   ;;  %v973_v14 = vld [vmem:[%s1368_s2 + $0x18] sm:$0xff] (!%p248_p0)   ;;  %v974_v17 = vld [vmem:[%s1368_s2 + $0x20] sm:$0xff] (!%p248_p0)  }
  0x1e   : > { %847 = vmatpush3.bf16.msra.mxu0 (!%p248_p0), %v970_v1  ;;  %858 = vmatprep.mubr.msk.bf16.mxu0 (!%p248_p0), %vm1068_vm2, %v1067_v0  ;;  %v975_v18 = vld [vmem:[%s1368_s2 + $0x28] sm:$0xff] (!%p248_p0)   ;;  %vm324_vm3 = vcmask (!%p248_p0), 261120   ;;  %vm327_vm4 = vcmask (!%p248_p0), 523264   ;;  %vm386_vm5 = vcmask (!%p248_p0), 785408   ;;  %v976_v31 = vld [vmem:[%s1370_s4] sm:$0xff] (!%p248_p0)   ;;  %v978_v33 = vld [vmem:[%s1370_s4 + $0x10] sm:$0xff] (!%p248_p0)  }
  0x1f   : > { %848 = vmatprep.subr.bf16.mxu0 (!%p248_p0), %v1067_v0  ;;  %874 = vmatprep.mubr.msk.bf16.mxu1 (!%p248_p0), %vm1068_vm2, %v1067_v0  ;;  %v977_v32 = vld [vmem:[%s1370_s4 + $0x8] sm:$0xff] (!%p248_p0)   ;;  %v979_v34 = vld [vmem:[%s1370_s4 + $0x18] sm:$0xff] (!%p248_p0)   ;;  %s285_s21 = sld [smem:[#allocation3 + %s1143_s13]] (!%p248_p0)  ;;  %v287_v36 = vshrl.u32 (!%p248_p0), %v286_v35, 7  ;;  %v980_v38 = vld [vmem:[%s1370_s4 + $0x20] sm:$0xff] (!%p248_p0)   ;;  %s820_s22 = sshll.u32 (!%p248_p0), %s1143_s13, 8 }
  0x20   : > { %863 = vmatpush3.bf16.msra.mxu1 (!%p248_p0), %v976_v31  ;;  %v790_v39 = vld [vmem:[%s1369_s3] ss:$0 sm:$0xff] (!%p248_p0)  ;;  %v981_v45 = vld [vmem:[%s1370_s4 + $0x28] sm:$0xff] (!%p248_p0)   ;;  %s1071_s28 = smov (!%p248_p0), [#allocation4]  }
  0x21   : > { %864 = vmatprep.subr.bf16.mxu1 (!%p248_p0), %v1067_v0  ;;  %v288_v40 = vadd.s32 (!%p248_p0), 8, %v287_v36 }
  0x22   : > { %849 = vmatpush3.bf16.msra.mxu0 (!%p248_p0), %v971_v2 }
  0x23   : > { %850 = vmatprep.subr.bf16.mxu0 (!%p248_p0), %v1067_v0 }
  0x24   : > { %s280_s23 = scalar_select %p279_p1, %s1143_s13, 1  ;;  %865 = vmatpush3.bf16.msra.mxu1 %v977_v32 }
  0x25   : > { %866 = vmatprep.subr.bf16.mxu1 %v1067_v0  ;;  %v289_v37 = vstv %s285_s21 }
  0x26   : > { %s819_s26 = sshll.u32 %s280_s23, 3  ;;  %851 = vmatpush3.bf16.msra.mxu0 %v972_v6  ;;  %s1070_s23 = smov 64   ;;  %vm1241_vm6 = vcmp.lt.s32.totalorder %v287_v36, %v289_v37  ;;  %vm1249_vm7 = vcmp.lt.s32.totalorder %v288_v40, %v289_v37 }
  0x27   : > { %s283_s29 = scalar_lea.vmem %s1367_s1, %s819_s26  ;;  %852 = vmatprep.subr.bf16.mxu0 %v1067_v0  ;;  %s1321_s26 = scalar_lea.hbm %s1374_s8, %s820_s22 }
  0x28   : > { %v822_v3 = vld [vmem:[%s283_s29] sm:$0xff]   ;;  %867 = vmatpush3.bf16.msra.mxu1 %v978_v33  ;;  %s1004_s29 = sshll.u32 %s1071_s28, 4  ;;  %s1005_s29 = int_to_ptr.vmem [resolvable:$false] %s1004_s29 }
  0x29   : > { %v823_v4 = vunpack.c.l.bf16 %v822_v3  ;;  %v824_v5 = vunpack.c.h.bf16 %v822_v3  ;;  %868 = vmatprep.subr.bf16.mxu1 %v1067_v0  ;;  %s1006_s30 = scalar_lea.vmem %s1005_s29, 512 }
  0x2a   : > { %853 = vmatpush3.bf16.msra.mxu0 %v973_v14  ;;  %v984_v14 = vld [vmem:[%s1372_s6 + $0x10] sm:$0xff]  }
  0x2b   : > { %v300_v7 = vrot.slane %v824_v5, 7  ;;  %v940_v8 = vpack.i.bf16 %v824_v5, %v823_v4  ;;  %v306_v9 = vrot.slane %v823_v4, 1  ;;  %v307_v10 = vrot.slane %v824_v5, 1  ;;  %854 = vmatprep.subr.bf16.mxu0 %v1067_v0 }
  0x2c   : > { %v299_v11 = vrot.slane %v823_v4, 7  ;;  %869 = vmatpush3.bf16.msra.mxu1 %v979_v34 }
  0x2d   : > { %941 = vrot.lane.b32.xlu0 %v940_v8, %s1069_s14  ;;  %v308_v12 = vsel %vm305_vm0, %v306_v9, %v307_v10  ;;  %v310_v13 = vsel %vm305_vm0, %v307_v10, 0.0  ;;  %870 = vmatprep.subr.bf16.mxu1 %v1067_v0 }
  0x2e   : > { %v945_v15 = vpack.i.bf16 %v310_v13, %v308_v12  ;;  %v301_v16 = vsel %vm298_vm1, %v299_v11, %v300_v7  ;;  %855 = vmatpush3.bf16.msra.mxu0 %v974_v17  ;;  %v304_v22 = vsel %vm298_vm1, 0.0, %v299_v11  ;;  %v982_v12 = vld [vmem:[%s1372_s6] sm:$0xff]   ;;  %v983_v13 = vld [vmem:[%s1372_s6 + $0x8] sm:$0xff]  }
  0x2f   : > { %856 = vmatprep.subr.bf16.mxu0 %v1067_v0  ;;  %v798_v17 = vld [vmem:[%s1371_s5] ss:$0 sm:$0xff] }
  0x30   : > { %871 = vmatpush3.bf16.msra.mxu1 %v980_v38 }
  0x31   : > { %946 = vrot.lane.b32.xlu0 %v945_v15, %s1070_s23  ;;  %872 = vmatprep.subr.bf16.mxu1 %v1067_v0  ;;  %v985_v15 = vld [vmem:[%s1372_s6 + $0x18] sm:$0xff]  }
  0x32   : > { %857 = vmatpush3.bf16.msra.mxu0 %v975_v18 }
  0x33   : > { %878 = vmatprep.subr.bf16.mxu0 %v1067_v0 }
  0x34   : > { %873 = vmatpush3.bf16.msra.mxu1 %v981_v45 }
  0x9f   : > { %v942_v19 = vpop.permute.xlu0 %941 }
  0xa0   : > { %v944_v20 = vunpack.i.h.bf16 %v942_v19  ;;  %v943_v21 = vunpack.i.l.bf16 %v942_v19  ;;  %v987_v19 = vld [vmem:[%s1372_s6 + $0x28] sm:$0xff]  }
  0xa2   : > { %v325_v26 = vsel %vm324_vm3, %v304_v22, %v943_v21  ;;  %v326_v27 = vsel %vm324_vm3, %v301_v16, %v944_v20  ;;  %v986_v16 = vld [vmem:[%s1372_s6 + $0x20] sm:$0xff]  }
  0xa3   : > { %v947_v23 = vpop.permute.xlu0 %946 }
  0xa4   : > { %v949_v24 = vunpack.i.h.bf16 %v947_v23  ;;  %v948_v25 = vunpack.i.l.bf16 %v947_v23 }
  0xa6   : > { %v328_v28 = vsel %vm327_vm4, %v325_v26, %v948_v25  ;;  %v329_v29 = vsel %vm327_vm4, %v326_v27, %v949_v24 }
  0xa7   : > { %v330_v30 = vpack.c.bf16 %v329_v29, %v328_v28 }
  0xa9   : > { %859 = vmatmul.mubr.msk.bf16.vlgmr.msra.gmra.mrb[0].mxu0 %vm386_vm5, %v330_v30 }
  0xaa   : > { %890 = vmatprep.mubr.msk.bf16.mxu0 %vm1068_vm2, %v1067_v0  ;;  %879 = vmatpush3.bf16.msra.mxu0 %v982_v12 }
  0xab   : > { %880 = vmatprep.subr.bf16.mxu0 %v1067_v0 }
  0xae   : > { %881 = vmatpush3.bf16.msra.mxu0 %v983_v13 }
  0xaf   : > { %882 = vmatprep.subr.bf16.mxu0 %v1067_v0 }
  0xb2   : > { %883 = vmatpush3.bf16.msra.mxu0 %v984_v14 }
  0xb3   : > { %884 = vmatprep.subr.bf16.mxu0 %v1067_v0 }
  0xb6   : > { %885 = vmatpush3.bf16.msra.mxu0 %v985_v15 }
  0xb7   : > { %886 = vmatprep.subr.bf16.mxu0 %v1067_v0 }
  0xba   : > { %887 = vmatpush3.bf16.msra.mxu0 %v986_v16 }
  0xbb   : > { %888 = vmatprep.subr.bf16.mxu0 %v1067_v0 }
  0xbe   : > { %889 = vmatpush3.bf16.msra.mxu0 %v987_v19 }
 0x17c   : > { %v424_v42 = vpop.f32.mrb[0].mxu0 }
 0x17d   : > { %v425_v43 = vadd.f32 %v790_v39, %v424_v42  ;;  %v860_v44 = vpop.f32.mrb[1].mxu0 }
 0x17e   : > { %v427_v47 = vpop.f32.mrb[2].mxu0 }
 0x17f   : > { %v435_v48 = vsel %vm1241_vm6, %v425_v43, 0.0  ;;  %v428_v49 = vadd.f32 %v790_v39, %v427_v47  ;;  %v861_v50 = vpop.f32.mrb[3].mxu0 }
 0x180   : > { %v437_v51 = vmax.f32 %v435_v48, 0.0 }
 0x181   : > { %v436_v52 = vsel %vm1249_vm7, %v428_v49, 0.0 }
 0x182   : > { %v438_v53 = vmax.f32 %v436_v52, 0.0  ;;  %v441_v54 = vrot.slane %v437_v51, 7  ;;  %v447_v55 = vrot.slane %v437_v51, 1 }
 0x184   : > { %v442_v56 = vrot.slane %v438_v53, 7  ;;  %v950_v57 = vpack.i.bf16 %v438_v53, %v437_v51  ;;  %v448_v58 = vrot.slane %v438_v53, 1  ;;  %v446_v4 = vsel %vm298_vm1, 0.0, %v441_v54  ;;  %v806_v51 = vld [vmem:[%s1373_s7] ss:$0 sm:$0xff] }
 0x186   : > { %951 = vrot.lane.b32.xlu1 %v950_v57, %s1069_s14  ;;  %v449_v59 = vsel %vm305_vm0, %v447_v55, %v448_v58  ;;  %v451_v60 = vsel %vm305_vm0, %v448_v58, 0.0  ;;  %v443_v61 = vsel %vm298_vm1, %v441_v54, %v442_v56 }
 0x187   : > { %v955_v62 = vpack.i.bf16 %v451_v60, %v449_v59 }
 0x18a   : > { %956 = vrot.lane.b32.xlu1 %v955_v62, %s1070_s23 }
 0x1f8   : > { %v952_v63 = vpop.permute.xlu1 %951 }
 0x1f9   : > { %v954_v1 = vunpack.i.h.bf16 %v952_v63  ;;  %v953_v2 = vunpack.i.l.bf16 %v952_v63 }
 0x1fb   : > { %v465_v7 = vsel %vm324_vm3, %v446_v4, %v953_v2  ;;  %v466_v8 = vsel %vm324_vm3, %v443_v61, %v954_v1 }
 0x1fc   : > { %v957_v3 = vpop.permute.xlu1 %956 }
 0x1fd   : > { %v959_v5 = vunpack.i.h.bf16 %v957_v3  ;;  %v958_v6 = vunpack.i.l.bf16 %v957_v3 }
 0x1ff   : > { %v467_v9 = vsel %vm327_vm4, %v465_v7, %v958_v6  ;;  %v468_v10 = vsel %vm327_vm4, %v466_v8, %v959_v5 }
 0x200   : > { %v469_v11 = vpack.c.bf16 %v468_v10, %v467_v9 }
 0x202   : > { %875 = vmatmul.mubr.msk.bf16.vlgmr.msra.gmra.mrb[0].mxu1 %vm386_vm5, %v469_v11 }
 0x2d5   : > { %v562_v18 = vpop.f32.mrb[0].mxu1 }
 0x2d6   : > { %v563_v20 = vadd.f32 %v798_v17, %v562_v18  ;;  %v876_v21 = vpop.f32.mrb[1].mxu1 }
 0x2d7   : > { %v565_v22 = vpop.f32.mrb[2].mxu1 }
 0x2d8   : > { %v569_v23 = vsel %vm1241_vm6, %v563_v20, 0.0  ;;  %v566_v24 = vadd.f32 %v798_v17, %v565_v22  ;;  %v877_v25 = vpop.f32.mrb[3].mxu1 }
 0x2d9   : > { %v571_v26 = vmax.f32 %v569_v23, 0.0 }
 0x2da   : > { %v570_v27 = vsel %vm1249_vm7, %v566_v24, 0.0 }
 0x2db   : > { %v572_v28 = vmax.f32 %v570_v27, 0.0  ;;  %v575_v0 = vrot.slane %v571_v26, 7  ;;  %v581_v29 = vrot.slane %v571_v26, 1 }
 0x2dd   : > { %v576_v30 = vrot.slane %v572_v28, 7  ;;  %v960_v31 = vpack.i.bf16 %v572_v28, %v571_v26  ;;  %v582_v32 = vrot.slane %v572_v28, 1  ;;  %v580_v42 = vsel %vm298_vm1, 0.0, %v575_v0 }
 0x2df   : > { %961 = vrot.lane.b32.xlu0 %v960_v31, %s1069_s14  ;;  %v583_v33 = vsel %vm305_vm0, %v581_v29, %v582_v32  ;;  %v585_v34 = vsel %vm305_vm0, %v582_v32, 0.0  ;;  %v577_v35 = vsel %vm298_vm1, %v575_v0, %v576_v30  ;;  %s276_s14 = sand.u32 1, %s1056_s11  }
 0x2e0   : > { %v965_v36 = vpack.i.bf16 %v585_v34, %v583_v33  ;;  %s1325_s13 = scalar_lea.sflag [#allocation5], %s276_s14 }
 0x2e2   : > { %966 = vrot.lane.b32.xlu1 %v965_v36, %s1070_s23  ;;  %s787_s23 = sshll.u32 %s276_s14, 4 }
 0x2e3   : > { %s278_s17 = scalar_lea.vmem [#allocation4], %s787_s23 }
 0x2e4   : > { %s721_s21 = sshll.u32 %s278_s17, 4  ;;  %s1316_s21 = int_to_ptr.vmem [resolvable:$true] %s721_s21 }
 0x2e5   : > { %s1000_s27 = scalar_lea.vmem %s1316_s21, 256  ;;  %p1007_p5 = scmp.lt.s32.totalorder %s1316_s21, %s1005_s29 }
 0x2e6   : > { %p1001_p2 = scmp.ne.s32.totalorder %s1316_s21, %s1000_s27  ;;  %p1008_p6 = scmp.lt.s32.totalorder %s1006_s30, %s1000_s27 }
 0x2e8   : > { %p1002_p3 = pnand %p1001_p2, %p1160_p10  ;;  %p1009_p7 = por %p1008_p6, %p1007_p5 }
 0x2ea   : > { %p1003_p4 = pneg %p1002_p3 }
 0x2ec   : > { %p1010_p8 = pnand %p1009_p7, %p1003_p4 }
 0x351   : > { %v962_v37 = vpop.permute.xlu0 %961 }
 0x352   : > { %v964_v38 = vunpack.i.h.bf16 %v962_v37  ;;  %v963_v39 = vunpack.i.l.bf16 %v962_v37 }
 0x354   : > { %v967_v40 = vpop.permute.xlu1 %966  ;;  %v599_v45 = vsel %vm324_vm3, %v580_v42, %v963_v39  ;;  %v600_v47 = vsel %vm324_vm3, %v577_v35, %v964_v38 }
 0x355   : > { %v969_v43 = vunpack.i.h.bf16 %v967_v40  ;;  %v968_v44 = vunpack.i.l.bf16 %v967_v40 }
 0x357   : > { %v601_v48 = vsel %vm327_vm4, %v599_v45, %v968_v44  ;;  %v602_v49 = vsel %vm327_vm4, %v600_v47, %v969_v43 }
 0x358   : > { %v603_v50 = vpack.c.bf16 %v602_v49, %v601_v48 }
 0x35a   : > { %891 = vmatmul.mubr.msk.bf16.vlgmr.msra.gmra.mrb[4].mxu0 %vm386_vm5, %v603_v50 }
 0x42d   : > { %v696_v52 = vpop.f32.mrb[4].mxu0 }
 0x42e   : > { %v697_v53 = vadd.f32 %v806_v51, %v696_v52  ;;  %v892_v54 = vpop.f32.mrb[5].mxu0 }
 0x42f   : > { %v699_v55 = vpop.f32.mrb[6].mxu0 }
 0x430   : > { %v703_v56 = vsel %vm1241_vm6, %v697_v53, 0.0  ;;  %v700_v57 = vadd.f32 %v806_v51, %v699_v55  ;;  %v893_v58 = vpop.f32.mrb[7].mxu0 }
 0x431   : > { %705 = vst [vmem:[%s278_s17] sm:$0xff] %v703_v56 }
 0x432   : > { %v704_v59 = vsel %vm1249_vm7, %v700_v57, 0.0 }
 0x433   : > { %706 = vst [vmem:[%s278_s17 + $0x8] sm:$0xff] %v704_v59 }
 0x434   : > { %1013 = shalt.err (!%p1010_p8)
}
 0x435   : > { %s1014_s14 = scalar_lea.hbm %s1321_s26, 256  ;;  %s1018_s16 = scalar_lea.hbm %s1374_s8, 512 }
 0x436   : > { %p1015_p9 = scmp.ne.s32.totalorder %s1321_s26, %s1014_s14  ;;  %p1019_p0 = scmp.lt.u32.totalorder %s1321_s26, %s1374_s8 }
 0x437   : > { %p1020_p1 = scmp.lt.u32.totalorder %s1018_s16, %s1014_s14  ;;  %p1022_p3 = scmp.lt.u32.totalorder %s1014_s14, %s1321_s26 }
 0x438   : > { %p1016_p12 = pnand %p1015_p9, %p1160_p10 }
 0x439   : > { %p1021_p2 = por %p1020_p1, %p1019_p0 }
 0x43a   : > { %p1017_p13 = pneg %p1016_p12 }
 0x43b   : > { %p1023_p4 = por %p1022_p3, %p1021_p2 }
 0x43d   : > { %p1024_p5 = pnand %p1023_p4, %p1017_p13 }
 0x43f   : > { %1027 = shalt.err (!%p1024_p5)
}
 0x440   : > { %s1072_s24 = smov 128   ;;  %s1073_s25 = smov 8  }
 0x441   : > { %894 = dma.vmem_to_hbm [thread:$0]  (%p1160_p10), %s1316_s21, 256, %s1321_s26, %s1325_s13, %s1072_s24, %s1072_s24, %s1073_s25  }
 0x442 PF: > { %p900_p6 = scmp.ge.s32.totalorder %s1064_s12, 2  ;;  %s736_s27 = sand.u32 1, %s1052_s10  }
 0x443   : > { %s737_s28 = scalar_lea.sflag [#allocation5], %s736_s27 }
 0x444   : > { %p897_p7 = pnand %p900_p6, %p1164_p11 }
 0x446   : > { %1047 = dma.done.wait (!%p897_p7), %s737_s28, 256  }
 0x447   : > { %1049 = vsyncadd (!%p897_p7), %s737_s28, 4294967040  ;;  %p24_p8 = scmp.ge.s32.totalorder %s1147_s15, 4   ;;  %s1381_s10 = smov %s1056_s11 }
 0x448   : > { %s1382_s11 = smov %s1060_s0  ;;  %s1383_s0 = smov %s1158_s18 }
 0x449   : > { %s1384_s12 = smov %s1147_s15  ;;  %26 = sbr.rel (!%p24_p8) target bundleno = 18 (0x12), region = 83 }
 0x450   :  { %742 = vsyncpa [#allocation5], 1 }
 0x451   :  { %744 = vsyncpa [#allocation5 + $0x1], 1 }

</bundles_post_ra>
